<compile_context>
chip_gen: v6e
topology: v6e:2x2x1
jax: 0.10.0
libtpu: 0.0.40
codegen_flags: <defaults>
</compile_context>

<pallas_src>
import functools

import jax
import jax.numpy as jnp
from jax.experimental import pallas as pl
from jax.experimental.pallas import tpu as pltpu


_LANE = 128


def _round_up(x, m):
    return ((x + m - 1) // m) * m


def _cdiv(a, b):
    return -(-a // b)


def _sublane_quantum(itemsize):
    # f32 -> 8, bf16/f16 -> 16, int8/fp8 -> 32 rows per packed (8,128) vreg tile.
    return max(8, 32 // itemsize)


def _vmem_policy():
    """Returns (vmem_limit_bytes, padded_per_step_block_budget_bytes)."""
    cap = None
    try:  # trace-time hardware query; guarded in case it is unavailable
        info = pltpu.get_tpu_info()
        cap = int(getattr(info, "vmem_capacity_bytes", 0)) or None
    except Exception:
        cap = None
    if cap is None:
        kind = ""
        try:
            kind = jax.devices()[0].device_kind.lower()
        except Exception:
            pass
        if any(s in kind for s in ("v4", "v5", "v6")):
            cap = 128 * 1024 * 1024
        else:
            cap = 64 * 1024 * 1024          # v7x per-TC / conservative default
    # v7x: <=48 MiB scoped limit; v5e/v6e: 64 MiB.  Budget = half of the limit
    # so the double-buffered in+out blocks always leave compiler headroom.
    vmem_limit = min(64 * 1024 * 1024, (cap * 3) // 4)
    return vmem_limit, vmem_limit // 2


def _step_bytes(bt, tt, C, V, itemsize, q, split_channels):
    """Padded VMEM bytes of one grid step (in + out blocks, double-buffered)."""
    rows = _round_up(tt, q)
    lanes_v = _round_up(V, _LANE)
    if split_channels:                                  # in (bt,tt,V), out (bt,tt,V)
        in_b = bt * rows * lanes_v * itemsize
        out_b = in_b
    else:                                               # in (bt,C,tt,V), out (bt,tt,C*V)
        in_b = bt * C * rows * lanes_v * itemsize
        out_b = bt * rows * _round_up(C * V, _LANE) * itemsize
    return 2 * (in_b + out_b)                           # x2: BlockSpec double buffering


def _pick_tiles(B, C, T, V, itemsize, split_channels, budget):
    q = _sublane_quantum(itemsize)
    # 1) one batch, whole T if the padded step fits; else largest q-multiple.
    if _step_bytes(1, T, C, V, itemsize, q, split_channels) <= budget:
        tt = T
    else:
        per_row = _step_bytes(1, q, C, V, itemsize, q, split_channels) // q
        tt = max(q, (budget // max(per_row, 1)) // q * q)
        tt = min(tt, T)
    # 2) grow the batch block while the padded step still fits.
    bt = 1
    if tt == T:
        per_batch = _step_bytes(1, T, C, V, itemsize, q, split_channels)
        bt = max(1, min(B, budget // max(per_batch, 1)))
    # 3) keep >=2 grid iterations when possible so v7x megacore shards the copy.
    iters = _cdiv(B, bt) * _cdiv(T, tt) * (C if split_channels else 1)
    if iters < 2:
        if B >= 2:
            bt = _cdiv(B, 2)
        elif T >= 2 * q:
            tt = _round_up(_cdiv(T, 2), q)
    return bt, tt


def _lane_aligned_copy_kernel(x_ref, o_ref):
    # V % 128 == 0 path: the channel interleave is done entirely by the
    # BlockSpec index maps at 128-lane-aligned offsets; the body is a pure
    # lane-dense VMEM copy (no VPU/XLU work at all).
    o_ref[...] = x_ref[...]


def _channel_interleave_kernel(x_ref, o_ref, *, C, V):
    # x_ref: (Bt, C, Tt, V)   o_ref: (Bt, Tt, C*V)
    # C is small & static -> the Python loop fully unrolls into C lane-slice
    # stores.  For V % 128 != 0 each store pays a lane rotate + masked store on
    # the otherwise-idle VPU/XLU; the kernel remains HBM-bandwidth bound.
    # TODO(synk): benchmark this against a single
    #   o_ref[...] = x_ref[...].transpose(0, 2, 1, 3).reshape(o_ref.shape)
    # relayout and against a DMA-side interleave (memory_space=pl.ANY input +
    # per-channel pltpu.make_async_copy into lane slices of the output block)
    # once a TPU is available for profiling; the latter was not adopted here
    # because sub-128-lane VMEM DMA destinations are a lowering risk.
    for c in range(C):
        o_ref[:, :, c * V:(c + 1) * V] = x_ref[:, c, :, :]


@functools.partial(jax.jit, static_argnames=("b_tile", "t_tile"))
def vector_channel_wise_concat(x, b_tile=None, t_tile=None):
    """x: (B, C, T, V) -> (B, T, C*V)   with  y[b, t, c*V+v] == x[b, c, t, v]."""
    B, C, T, V = x.shape
    itemsize = jnp.dtype(x.dtype).itemsize
    q = _sublane_quantum(itemsize)
    vmem_limit, budget = _vmem_policy()
    split_channels = (V % _LANE == 0)

    bt, tt = _pick_tiles(B, C, T, V, itemsize, split_channels, budget)
    if b_tile is not None:
        bt = int(b_tile)
    if t_tile is not None:
        tt = int(t_tile)
    assert tt == T or tt % q == 0, (
        "t_tile must be the full T extent or a multiple of the sublane quantum")

    out_shape = jax.ShapeDtypeStruct((B, T, C * V), x.dtype)
    cost = pl.CostEstimate(flops=0, transcendentals=0,
                           bytes_accessed=2 * B * C * T * V * itemsize)

    if split_channels:
        # Grid carries the channel axis; output blocks land at c*V lane
        # offsets (multiples of 128), so the interleave is pure DMA work.
        grid = (pl.cdiv(B, bt), C, pl.cdiv(T, tt))
        in_specs = [pl.BlockSpec((bt, None, tt, V), lambda i, c, j: (i, c, j, 0))]
        out_specs = pl.BlockSpec((bt, tt, V), lambda i, c, j: (i, j, c))
        kernel = _lane_aligned_copy_kernel
        semantics = ("parallel", "parallel", "parallel")
    else:
        grid = (pl.cdiv(B, bt), pl.cdiv(T, tt))
        in_specs = [pl.BlockSpec((bt, C, tt, V), lambda i, j: (i, 0, j, 0))]
        out_specs = pl.BlockSpec((bt, tt, C * V), lambda i, j: (i, j, 0))
        kernel = functools.partial(_channel_interleave_kernel, C=C, V=V)
        semantics = ("parallel", "parallel")

    return pl.pallas_call(
        kernel,
        out_shape=out_shape,
        grid_spec=pltpu.PrefetchScalarGridSpec(
            num_scalar_prefetch=0,
            grid=grid,
            in_specs=in_specs,
            out_specs=out_specs,
        ),
        compiler_params=pltpu.CompilerParams(
            dimension_semantics=semantics,
            vmem_limit_bytes=vmem_limit,
        ),
        cost_estimate=cost,
    )(x)


class VectorChannelWiseConcatenationLayer:
    """JAX/Pallas port of the PyTorch module."""

    def __init__(self):
        self._setup_done = False
        self.vector_size = None
        self.number_of_channels = None
        self.index_of_channel_dimension = None
        self.concatenated_vector_size = None

    def setup(self, vector_size, number_of_channels, index_of_channel_dimension):
        assert not self._setup_done
        assert vector_size > 0 and number_of_channels >= 1
        self.vector_size = vector_size
        self.number_of_channels = number_of_channels
        self.index_of_channel_dimension = index_of_channel_dimension
        self.concatenated_vector_size = vector_size * number_of_channels
        self._setup_done = True
        return self.concatenated_vector_size

    def __call__(self, x):
        assert self._setup_done
        shape = x.shape
        ch = self.index_of_channel_dimension
        assert len(shape) >= 2 and ch != len(shape) - 1
        assert shape[ch] == self.number_of_channels
        assert shape[-1] == self.vector_size
        if self.number_of_channels == 1:
            # TODO(synk): the PyTorch module calls .unsqueeze here, which
            # contradicts its own shape assertion; the intended behaviour is
            # removing the singleton channel axis, which is what we do.
            return jnp.squeeze(x, axis=ch)
        if x.ndim == 4 and ch == 1:
            return vector_channel_wise_concat(x)
        # Generic-layout fallback (torch.unbind + cat == move channel next to
        # the vector axis and merge); plain JAX, no Pallas kernel needed.
        y = jnp.moveaxis(x, ch, -2)
        return y.reshape(y.shape[:-2] + (self.concatenated_vector_size,))


if __name__ == "__main__":
    key = jax.random.PRNGKey(0)
    k1, k2, k3 = jax.random.split(key, 3)

    # ---- Test 1: f32, (B, C, T, V) = (2, 4, 16, 16)  (C*V < 128 path).
    B, C, T, V = 2, 4, 16, 16
    x = jax.random.normal(k1, (B, C, T, V), dtype=jnp.float32)

    layer = VectorChannelWiseConcatenationLayer()
    concat_size = layer.setup(vector_size=V, number_of_channels=C,
                              index_of_channel_dimension=1)
    assert concat_size == C * V

    out = jax.block_until_ready(layer(x))
    ref = jnp.concatenate([x[:, c] for c in range(C)], axis=-1)
    assert out.shape == (B, T, C * V)
    assert jnp.array_equal(out, ref), "f32 mismatch vs reference concatenation"

    # ---- Test 2: bf16, forced tiling with a ragged T tail (T=40, Tt=16).
    B2, C2, T2, V2 = 2, 4, 40, 16
    x2 = jax.random.normal(k2, (B2, C2, T2, V2), dtype=jnp.bfloat16)
    out2 = jax.block_until_ready(
        vector_channel_wise_concat(x2, b_tile=1, t_tile=16))
    ref2 = jnp.concatenate([x2[:, c] for c in range(C2)], axis=-1)
    assert out2.shape == (B2, T2, C2 * V2)
    assert jnp.array_equal(out2, ref2), "bf16 mismatch vs reference concatenation"

    # ---- Test 3: f32, V % 128 == 0 fast path (BlockSpec-only interleave).
    B3, C3, T3, V3 = 2, 3, 24, 128
    x3 = jax.random.normal(k3, (B3, C3, T3, V3), dtype=jnp.float32)
    out3 = jax.block_until_ready(vector_channel_wise_concat(x3))
    ref3 = jnp.concatenate([x3[:, c] for c in range(C3)], axis=-1)
    assert out3.shape == (B3, T3, C3 * V3)
    assert jnp.array_equal(out3, ref3), "V%128==0 path mismatch vs reference"

    print("KERNEL_OK")
</pallas_src>

<mosaic_0001>
module attributes {stable_mosaic.version = 11 : i64} {
  func.func @_channel_interleave_kernel(%arg0: i32, %arg1: i32, %arg2: memref<1x4x16x16xf32, #tpu.memory_space<vmem>>, %arg3: memref<1x16x64xf32, #tpu.memory_space<vmem>>) attributes {dimension_semantics = [#tpu.dimension_semantics<parallel>, #tpu.dimension_semantics<parallel>], iteration_bounds = array<i64: 2, 1>, scalar_prefetch = 0 : i64, scratch_operands = 0 : i64, tpu.core_type = #tpu.core_type<tc>, window_params = [{transform_indices = @transform_0, window_bounds = array<i64: 1, 4, 16, 16>}, {transform_indices = @transform_1, window_bounds = array<i64: 1, 16, 64>}]} {
    %c0 = arith.constant 0 : index
    %c0_0 = arith.constant 0 : index
    %c0_1 = arith.constant 0 : index
    %c0_2 = arith.constant 0 : index
    %0 = vector.load %arg2[%c0, %c0_0, %c0_1, %c0_2] : memref<1x4x16x16xf32, #tpu.memory_space<vmem>>, vector<1x1x16x16xf32>
    %1 = vector.shape_cast %0 : vector<1x1x16x16xf32> to vector<1x16x16xf32>
    %c0_3 = arith.constant 0 : index
    %c0_4 = arith.constant 0 : index
    %c0_5 = arith.constant 0 : index
    %2 = vector.load %arg3[%c0_3, %c0_4, %c0_5] : memref<1x16x64xf32, #tpu.memory_space<vmem>>, vector<1x16x16xf32>
    tpu.vector_store %arg3[%c0_3, %c0_4, %c0_5], %1 {strides = array<i32>} : memref<1x16x64xf32, #tpu.memory_space<vmem>>, vector<1x16x16xf32>,
    %c0_6 = arith.constant 0 : index
    %c1 = arith.constant 1 : index
    %c0_7 = arith.constant 0 : index
    %c0_8 = arith.constant 0 : index
    %3 = vector.load %arg2[%c0_6, %c1, %c0_7, %c0_8] : memref<1x4x16x16xf32, #tpu.memory_space<vmem>>, vector<1x1x16x16xf32>
    %4 = vector.shape_cast %3 : vector<1x1x16x16xf32> to vector<1x16x16xf32>
    %c0_9 = arith.constant 0 : index
    %c0_10 = arith.constant 0 : index
    %c16 = arith.constant 16 : index
    %5 = vector.load %arg3[%c0_9, %c0_10, %c16] : memref<1x16x64xf32, #tpu.memory_space<vmem>>, vector<1x16x16xf32>
    tpu.vector_store %arg3[%c0_9, %c0_10, %c16], %4 {strides = array<i32>} : memref<1x16x64xf32, #tpu.memory_space<vmem>>, vector<1x16x16xf32>,
    %c0_11 = arith.constant 0 : index
    %c2 = arith.constant 2 : index
    %c0_12 = arith.constant 0 : index
    %c0_13 = arith.constant 0 : index
    %6 = vector.load %arg2[%c0_11, %c2, %c0_12, %c0_13] : memref<1x4x16x16xf32, #tpu.memory_space<vmem>>, vector<1x1x16x16xf32>
    %7 = vector.shape_cast %6 : vector<1x1x16x16xf32> to vector<1x16x16xf32>
    %c0_14 = arith.constant 0 : index
    %c0_15 = arith.constant 0 : index
    %c32 = arith.constant 32 : index
    %8 = vector.load %arg3[%c0_14, %c0_15, %c32] : memref<1x16x64xf32, #tpu.memory_space<vmem>>, vector<1x16x16xf32>
    tpu.vector_store %arg3[%c0_14, %c0_15, %c32], %7 {strides = array<i32>} : memref<1x16x64xf32, #tpu.memory_space<vmem>>, vector<1x16x16xf32>,
    %c0_16 = arith.constant 0 : index
    %c3 = arith.constant 3 : index
    %c0_17 = arith.constant 0 : index
    %c0_18 = arith.constant 0 : index
    %9 = vector.load %arg2[%c0_16, %c3, %c0_17, %c0_18] : memref<1x4x16x16xf32, #tpu.memory_space<vmem>>, vector<1x1x16x16xf32>
    %10 = vector.shape_cast %9 : vector<1x1x16x16xf32> to vector<1x16x16xf32>
    %c0_19 = arith.constant 0 : index
    %c0_20 = arith.constant 0 : index
    %c48 = arith.constant 48 : index
    %11 = vector.load %arg3[%c0_19, %c0_20, %c48] : memref<1x16x64xf32, #tpu.memory_space<vmem>>, vector<1x16x16xf32>
    tpu.vector_store %arg3[%c0_19, %c0_20, %c48], %10 {strides = array<i32>} : memref<1x16x64xf32, #tpu.memory_space<vmem>>, vector<1x16x16xf32>,
    return
  }
  func.func @transform_0(%arg0: i32, %arg1: i32) -> (i32, i32, i32, i32) {
    %c0_i32 = arith.constant 0 : i32
    %c0_i32_0 = arith.constant 0 : i32
    %c0_i32_1 = arith.constant 0 : i32
    return %arg0, %c0_i32, %arg1, %c0_i32_0 : i32, i32, i32, i32
  }
  func.func @transform_1(%arg0: i32, %arg1: i32) -> (i32, i32, i32) {
    %c0_i32 = arith.constant 0 : i32
    %c0_i32_0 = arith.constant 0 : i32
    return %arg0, %arg1, %c0_i32 : i32, i32, i32
  }
}

</mosaic_0001>

<bundles_post_ra>
// kernel: vector_channel_wise_concat.1
= control target key start
LH: loop header
LB: loop body
LE: loop exit
PB: predicated region body
PF: predicated region fallthrough
CT: control target
= control target key end

     0   :  { %6 = vsyncpa [#allocation3], 0  ;;  %s673_s0 = inlined_call_operand.hbm [shape: f32[2,4,16,16], index: 0, kind: input, shape index: {}]   ;;  %s674_s1 = inlined_call_operand.hbm [shape: f32[2,16,64], index: 1, kind: output, shape index: {}]  }
   0x1   :  { %8 = vsyncpa [#allocation3 + $0x1], 0 }
   0x2   :  { %9 = vsyncpa [#allocation4], 0 }
   0x3   :  { %11 = vsyncpa [#allocation4 + $0x1], 0  ;;  %s526_s6 = smov 0   ;;  %s528_s7 = smov 0  }
   0x4   :  { %s530_s8 = smov 0   ;;  %s532_s9 = smov 0  }
   0x5   :  { %s534_s10 = smov 0   ;;  %s536_s11 = smov 0  }
   0x6 LB: > { %s305_s12 = sadd.s32 4294967295, %s505_s11   ;;  %s306_s13 = sadd.s32 4294967294, %s505_s11   ;;  %s505_s11 = sphi %s536_s11, %s17_s11   ;;  %s501_s10 = sphi %s534_s10, %s685_s10   ;;  %s497_s9 = sphi %s532_s9, %s684_s9   ;;  %s493_s8 = sphi %s530_s8, %s683_s8   ;;  %s489_s7 = sphi %s528_s7, %s682_s7   ;;  %s485_s6 = sphi %s526_s6, %s681_s6  }
   0x7   : > { %s29_s14 = sadd.s32 1, %s501_s10  ;;  %s38_s15 = sadd.s32 1, %s493_s8 }
   0x8   : > { %p31_p0 = scmp.ge.s32.totalorder %s29_s14, 2  ;;  %p45_p1 = scmp.ne.s32.totalorder %s493_s8, %s489_s7 }
   0x9   : > { %p46_p2 = scmp.eq.s32.totalorder %s505_s11, 0  ;;  %p51_p3 = scmp.ne.s32.totalorder %s489_s7, %s485_s6 }
   0xa   : > { %s687_s14 = smov (%p31_p0, %s29_s14), 0  ;;  %p52_p5 = scmp.eq.s32.totalorder %s305_s12, 0 }
   0xb   : > { %p567_p4 = por %p46_p2, %p45_p1  ;;  %s33_s17 = ssub.s32 %s501_s10, %s687_s14 }
   0xc   : > { %p77_p6 = scmp.eq.s32.totalorder %s305_s12, 1  ;;  %p36_p7 = scmp.eq.s32.totalorder %s33_s17, 0 }
   0xd   : > { %p573_p8 = por %p52_p5, %p51_p3  ;;  %p83_p10 = scmp.eq.s32.totalorder %s306_s13, 1 }
   0xe   : > { %p577_p9 = por %p77_p6, %p45_p1  ;;  %p340_p13 = scmp.lt.s32.totalorder %s505_s11, 2 }
   0xf   : > { %s582_s20 = scalar_select %p36_p7, %s493_s8, %s38_s15  }
  0x10   : > { %p584_p11 = por %p83_p10, %p51_p3  ;;  %s103_s22 = sand.u32 1, %s493_s8  }
  0x11   : > { %s309_s23 = sshll.u32 %s103_s22, 6  ;;  %s326_s24 = sshll.u32 %s501_s10, 10 }
  0x12   : > { %s115_s27 = scalar_lea.hbm %s673_s0, %s326_s24  ;;  %s107_s28 = scalar_lea.vmem [#allocation2], %s309_s23 }
  0x13   : > { %s116_s29 = sshll.u32 %s107_s28, 4  ;;  %p597_p0 = pnand %p340_p13, %p567_p4  ;;  %s117_s29 = int_to_ptr.vmem [resolvable:$true] %s116_s29 }
  0x14   : > { %p312_p1 = scmp.ge.s32.totalorder %s505_s11, 1  ;;  %s104_s2 = scalar_lea.sflag [#allocation3], %s103_s22 }
  0x15   : > { %p399_p2 = pneg %p597_p0  ;;  %s410_s3 = scalar_lea.vmem %s117_s29, 1024 }
  0x16   : > { %p411_p3 = scmp.ne.s32.totalorder %s117_s29, %s410_s3  ;;  %s507_s4 = smov [#allocation2]  }
  0x17   : > { %s415_s5 = sshll.u32 %s507_s4, 4  ;;  %s416_s5 = int_to_ptr.vmem [resolvable:$false] %s415_s5 }
  0x18   : > { %p413_p5 = pnand %p411_p3, %p399_p2  ;;  %s417_s12 = scalar_lea.vmem %s416_s5, 2048 }
  0x19   : > { %p418_p7 = scmp.lt.s32.totalorder %s117_s29, %s416_s5  ;;  %p419_p10 = scmp.lt.s32.totalorder %s417_s12, %s410_s3 }
  0x1a   : > { %p414_p6 = pneg %p413_p5 }
  0x1b   : > { %p420_p12 = por %p419_p10, %p418_p7 }
  0x1d   : > { %p421_p4 = pnand %p420_p12, %p414_p6 }
  0x1f   : > { %424 = shalt.err (!%p421_p4)
}
  0x20   : > { %s508_s13 = smov 128   ;;  %s509_s15 = smov 8  }
  0x21   : > { %335 = dma.hbm_to_vmem [thread:$0]  (!%p597_p0), %s115_s27, 1024, %s117_s29, %s104_s2, %s508_s13, %s508_s13, %s509_s15  }
  0x22   : > { %p124_p13 = scmp.lt.s32.totalorder %s505_s11, 3 }
  0x24   : > { %p125_p2 = pnand %p312_p1, %p124_p13 }
  0x25   : > { %s610_s16 = sand.u32 (!%p125_p2), 1, %s489_s7  }
  0x26   : > { %128 = sbr.rel (%p125_p2) target bundleno = 183 (0xb7), region = 24  ;;  %s313_s17 = sshll.u32 (!%p125_p2), %s610_s16, 6 }
  0x27   : > { %s131_s22 = scalar_lea.sflag (!%p125_p2), [#allocation3], %s610_s16  ;;  %s134_s23 = scalar_lea.vmem (!%p125_p2), [#allocation2], %s313_s17 }
  0x2b   : > { %476 = dma.done.wait (%p573_p8), %s131_s22, 1024  }
  0x2c   : > { %478 = vsyncadd (%p573_p8), %s131_s22, 4294966272  ;;  %s314_s24 = sshll.u32 %s610_s16, 4  ;;  %v317_v0 = vld [vmem:[%s134_s23 + $0x20] sm:$0xff]  ;;  %v315_v1 = vld [vmem:[%s134_s23 + $0x10] sm:$0xff]  ;;  %vm157_vm0 = vcmask 130048   ;;  %s510_s25 = smov 32  }
  0x2d   : > { %179 = vrot.lane.b32.xlu1 %v317_v0, %s510_s25  ;;  %s511_s26 = smov 16   ;;  %v318_v2 = vld [vmem:[%s134_s23 + $0x28] sm:$0xff]  ;;  %v316_v3 = vld [vmem:[%s134_s23 + $0x18] sm:$0xff]  ;;  %v155_v4 = vld [vmem:[%s134_s23] sm:$0xff]  ;;  %s152_s27 = scalar_lea.vmem [#allocation5], %s314_s24  ;;  %vm171_vm1 = vcmask 261248  }
  0x2e   : > { %165 = vrot.lane.b32.xlu0 %v315_v1, %s511_s26  ;;  %v156_v5 = vld [vmem:[%s134_s23 + $0x8] sm:$0xff]  ;;  %158 = vst.msk [vmem:[%s152_s27] sm:$0xff] %vm157_vm0, %v155_v4  ;;  %v320_v6 = vld [vmem:[%s134_s23 + $0x38] sm:$0xff]  ;;  %s512_s18 = smov 48   ;;  %vm185_vm2 = vcmask 392448   ;;  %s327_s28 = sshll.u32 %s497_s9, 8 }
  0x2f   : > { %159 = vst.msk [vmem:[%s152_s27 + $0x8] sm:$0xff] %vm157_vm0, %v156_v5  ;;  %v319_v7 = vld [vmem:[%s134_s23 + $0x30] sm:$0xff]  ;;  %s218_s29 = sshll.u32 %s152_s27, 4  ;;  %vm199_vm3 = vcmask 523648   ;;  %s623_s3 = scalar_lea.hbm %s674_s1, %s327_s28  ;;  %s625_s29 = int_to_ptr.vmem [resolvable:$true] %s218_s29 }
  0x30   : > { %s203_s9 = scalar_lea.sflag [#allocation4], %s610_s16  ;;  %s425_s4 = scalar_lea.vmem %s625_s29, 256 }
  0x31   : > { %181 = vrot.lane.b32.xlu1 %v318_v2, %s510_s25  ;;  %p426_p8 = scmp.ne.s32.totalorder %s625_s29, %s425_s4  ;;  %s513_s5 = smov [#allocation5]  }
  0x32   : > { %167 = vrot.lane.b32.xlu0 %v316_v3, %s511_s26  ;;  %s429_s12 = sshll.u32 %s513_s5, 4  ;;  %s430_s12 = int_to_ptr.vmem [resolvable:$false] %s429_s12 }
  0x33   : > { %p427_p12 = pnand %p426_p8, %p577_p9  ;;  %s431_s13 = scalar_lea.vmem %s430_s12, 512 }
  0x34   : > { %p432_p1 = scmp.lt.s32.totalorder %s625_s29, %s430_s12  ;;  %p433_p3 = scmp.lt.s32.totalorder %s431_s13, %s425_s4 }
  0x35   : > { %195 = vrot.lane.b32.xlu1 %v320_v6, %s512_s18  ;;  %p428_p0 = pneg %p427_p12 }
  0x36   : > { %193 = vrot.lane.b32.xlu0 %v319_v7, %s512_s18  ;;  %p434_p5 = por %p433_p3, %p432_p1 }
  0x38   : > { %p435_p6 = pnand %p434_p5, %p428_p0 }
  0x9f   : > { %v180_v8 = vpop.permute.xlu1 %179 }
  0xa0   : > { %v166_v9 = vpop.permute.xlu0 %165 }
  0xa1   : > { %172 = vst.msk [vmem:[%s152_s27] sm:$0xff] %vm171_vm1, %v166_v9 }
  0xa2   : > { %186 = vst.msk [vmem:[%s152_s27] sm:$0xff] %vm185_vm2, %v180_v8 }
  0xa3   : > { %v182_v10 = vpop.permute.xlu1 %181 }
  0xa4   : > { %v168_v11 = vpop.permute.xlu0 %167 }
  0xa5   : > { %173 = vst.msk [vmem:[%s152_s27 + $0x8] sm:$0xff] %vm171_vm1, %v168_v11 }
  0xa6   : > { %187 = vst.msk [vmem:[%s152_s27 + $0x8] sm:$0xff] %vm185_vm2, %v182_v10 }
  0xa7   : > { %v196_v12 = vpop.permute.xlu1 %195 }
  0xa8   : > { %v194_v13 = vpop.permute.xlu0 %193  ;;  %201 = vst.msk [vmem:[%s152_s27 + $0x8] sm:$0xff] %vm199_vm3, %v196_v12 }
  0xa9   : > { %200 = vst.msk [vmem:[%s152_s27] sm:$0xff] %vm199_vm3, %v194_v13 }
  0xaa   : > { %438 = shalt.err (!%p435_p6)
}
  0xab   : > { %s439_s15 = scalar_lea.hbm %s623_s3, 256  ;;  %s443_s23 = scalar_lea.hbm %s674_s1, 512 }
  0xac   : > { %p440_p7 = scmp.ne.s32.totalorder %s623_s3, %s439_s15  ;;  %p444_p13 = scmp.lt.s32.totalorder %s623_s3, %s674_s1 }
  0xad   : > { %p445_p2 = scmp.lt.s32.totalorder %s443_s23, %s439_s15 }
  0xae   : > { %p441_p10 = pnand %p440_p7, %p577_p9 }
  0xaf   : > { %p446_p8 = por %p445_p2, %p444_p13 }
  0xb0   : > { %p442_p4 = pneg %p441_p10 }
  0xb2   : > { %p447_p12 = pnand %p446_p8, %p442_p4 }
  0xb4   : > { %450 = shalt.err (!%p447_p12)
}
  0xb5   : > { %s514_s26 = smov 128   ;;  %s515_s27 = smov 8  }
  0xb6   : > { %330 = dma.vmem_to_hbm [thread:$0]  (%p577_p9), %s625_s29, 256, %s623_s3, %s203_s9, %s514_s26, %s514_s26, %s515_s27  }
  0xb7 PF: > { %s233_s18 = sand.u32 1, %s485_s6   ;;  %p680_p0 = scmp.ge.s32.totalorder %s505_s11, 2 }
  0xb8   : > { %s234_s28 = scalar_lea.sflag [#allocation4], %s233_s18 }
  0xb9   : > { %p337_p1 = pnand %p680_p0, %p584_p11 }
  0xbb   : > { %p338_p3 = pneg %p337_p1 }
  0xbd   : > { %480 = dma.done.wait (%p338_p3), %s234_s28, 256  }
  0xbe   : > { %482 = vsyncadd (%p338_p3), %s234_s28, 4294967040  ;;  %s17_s11 = sadd.s32 1, %s505_s11   ;;  %s681_s6 = smov %s489_s7 }
  0xbf   : > { %p14_p5 = scmp.ge.s32.totalorder %s17_s11, 4   ;;  %s682_s7 = smov %s493_s8 }
  0xc0   : > { %s683_s8 = smov %s582_s20  ;;  %s684_s9 = smov %s501_s10 }
  0xc1   : > { %s685_s10 = smov %s687_s14  ;;  %16 = sbr.rel (!%p14_p5) target bundleno = 6 (0x6), region = 72 }
  0xc6   :  { %239 = vsyncpa [#allocation3], 1 }
  0xc7   :  { %241 = vsyncpa [#allocation3 + $0x1], 1 }
  0xc8   :  { %242 = vsyncpa [#allocation4], 1 }
  0xc9   :  { %244 = vsyncpa [#allocation4 + $0x1], 1 }

</bundles_post_ra>
